<compile_context>
chip_gen: v6e
topology: v6e:2x2x1
jax: 0.10.0
libtpu: 0.0.40
codegen_flags: <defaults>
</compile_context>

<pallas_src>
import math

import jax
import jax.numpy as jnp
from jax.experimental import pallas as pl
from jax.experimental.pallas import tpu as pltpu

_SUBLANE = 8
_LANE = 128


def _round_up(x, m):
    return (x + m - 1) // m * m


def _cdiv(a, b):
    return (a + b - 1) // b


def _lora_kernel(alpha_ref, x_ref, a_ref, b_ref, o_ref):
    # First matmul: (tm, fin) @ (fin, rank) with f32 accumulation on the MXU.
    xa = jnp.dot(x_ref[...], a_ref[...], preferred_element_type=jnp.float32)
    # Scale the tiny (tm, rank) intermediate instead of the (tm, tn) output:
    # fout/rank (~32-2048x) less VPU work in the store epilogue.
    xa = alpha_ref[0] * xa
    # Second matmul: (tm, rank) @ (rank, tn), f32 accumulation, single cast+store.
    out = jnp.dot(xa.astype(b_ref.dtype), b_ref[...],
                  preferred_element_type=jnp.float32)
    o_ref[...] = out.astype(o_ref.dtype)


def _default_vmem_limit():
    try:
        cap = int(pltpu.get_tpu_info().vmem_capacity_bytes)
    except Exception:
        cap = 64 * 1024 * 1024  # conservative fallback (v7x-sized)
    # ~100 MiB on 128 MiB parts (v5e/v6e), ~50 MiB on 64 MiB parts (v7x).
    return int(cap * 0.78)


def lora_forward(x, A, B, alpha, *, tile_m=512, tile_n=2048,
                 compute_dtype=None, vmem_limit_bytes=None):
    """alpha * (x @ A @ B) via a fused Pallas TPU kernel.

    compute_dtype: optionally run I/O in bf16 (halves HBM bytes; looser numerics).
    Default (None) keeps the input dtype, matching the PyTorch module exactly.
    """
    M, feature_in = x.shape
    fin_a, rank = A.shape
    rank_b, feature_out = B.shape
    assert feature_in == fin_a and rank == rank_b

    dtype = jnp.dtype(compute_dtype) if compute_dtype is not None else x.dtype
    # Note: A/B are cast to the compute dtype; with the default path this is a no-op.
    x = x.astype(dtype)
    A = A.astype(dtype)
    B = B.astype(dtype)
    itemsize = jnp.dtype(dtype).itemsize

    if vmem_limit_bytes is None:
        vmem_limit_bytes = _default_vmem_limit()

    # --- rank: pad only to the dtype's native sublane tile (cheap, keeps layouts native).
    sub = _SUBLANE * max(1, 4 // itemsize)          # 8 (f32), 16 (bf16), 32 (int8)
    rank_p = _round_up(rank, sub)
    # --- feature_out: pad to a lane-dense multiple of 128 (unmasked vst stores).
    fout_p = max(_LANE, _round_up(feature_out, _LANE))
    if rank_p != rank:
        A = jnp.pad(A, ((0, 0), (0, rank_p - rank)))
    if rank_p != rank or fout_p != feature_out:
        B = jnp.pad(B, ((0, rank_p - rank), (0, fout_p - feature_out)))

    # --- Tile selection (big row tiles; shrink N first, keep tm large). ---
    tm = max(_SUBLANE, _round_up(min(tile_m, _round_up(M, _SUBLANE)), _SUBLANE))
    tn = min(fout_p, max(_LANE, _round_up(tile_n, _LANE)))

    def _vmem_est(t_m, t_n):
        return (2 * t_m * feature_in * itemsize        # x blocks (double-buffered)
                + 2 * t_m * t_n * itemsize             # out blocks (double-buffered)
                + 2 * feature_in * rank_p * itemsize   # A (tiny; 2 bufs reserved)
                + 2 * rank_p * t_n * itemsize          # B column blocks
                + t_m * rank_p * 4                     # xa f32 intermediate
                + t_m * t_n * 4                        # f32 result / cast epilogue temp
                + (1 << 20))                           # Mosaic internal scratch headroom

    budget = int(0.6 * vmem_limit_bytes)
    while _vmem_est(tm, tn) > budget:
        if tn > 4 * _LANE:
            tn = max(4 * _LANE, _round_up(tn // 2, _LANE))
        elif tm > _SUBLANE:
            tm = max(_SUBLANE, _round_up(tm // 2, _SUBLANE))
        else:
            break

    n_m = _cdiv(M, tm)            # partial tail block handled by Pallas masking
    n_n = _cdiv(fout_p, tn)
    # Guarantee >=2 grid steps for v7x megacore even when everything fits one tile.
    if n_m * n_n == 1 and fout_p >= 2 * _LANE:
        tn = _round_up(_cdiv(fout_p, 2), _LANE)
        n_n = _cdiv(fout_p, tn)

    alpha_arr = jnp.asarray([alpha], dtype=jnp.float32)   # SMEM scalar, no retrace per alpha

    flops = 2 * M * feature_in * rank + 2 * M * rank * feature_out
    bytes_accessed = (M * feature_in + feature_in * rank
                      + rank * feature_out + M * feature_out) * itemsize
    cost = pl.CostEstimate(flops=flops, transcendentals=0,
                           bytes_accessed=bytes_accessed)

    out = pl.pallas_call(
        _lora_kernel,
        out_shape=jax.ShapeDtypeStruct((M, fout_p), dtype),
        grid_spec=pltpu.PrefetchScalarGridSpec(
            num_scalar_prefetch=0,
            grid=(n_m, n_n),
            in_specs=[
                # alpha: scalar in SMEM
                pl.BlockSpec(memory_space=pltpu.MemorySpace.SMEM),
                # x: row tile, constant across the inner N axis (not re-fetched)
                pl.BlockSpec((tm, feature_in), lambda i, j: (i, 0)),
                # A: tiny, fully resident
                pl.BlockSpec((feature_in, rank_p), lambda i, j: (0, 0)),
                # B: column tile
                pl.BlockSpec((rank_p, tn), lambda i, j: (0, j)),
            ],
            out_specs=pl.BlockSpec((tm, tn), lambda i, j: (i, j)),
        ),
        compiler_params=pltpu.CompilerParams(
            dimension_semantics=("parallel", "parallel"),
            vmem_limit_bytes=vmem_limit_bytes,
        ),
        cost_estimate=cost,
    )(alpha_arr, x, A, B)

    if fout_p != feature_out:
        out = out[:, :feature_out]
    return out


if __name__ == "__main__":
    # Small shapes consistent with the module's forward.
    batch = 8
    feature_in = 32
    feature_out = 32
    rank = 4
    alpha = 2.0

    key = jax.random.PRNGKey(0)
    kx, ka, kb, kx3, ka3, kb3 = jax.random.split(key, 6)

    # Deterministic parameter init mirroring the PyTorch module:
    #   A: kaiming_uniform_(a=sqrt(5)) on (feature_in, rank) -> bound = 1/sqrt(rank)
    #   B: zeros
    bound = 1.0 / math.sqrt(rank)
    A = jax.random.uniform(ka, (feature_in, rank), jnp.float32,
                           minval=-bound, maxval=bound)
    B_zero = jnp.zeros((rank, feature_out), jnp.float32)
    x = jax.random.normal(kx, (batch, feature_in), jnp.float32)

    # 1) Exact module semantics (B initialised to zeros).
    out = jax.block_until_ready(lora_forward(x, A, B_zero, alpha))
    ref = alpha * (x @ A @ B_zero)
    assert out.shape == (batch, feature_out)
    assert jnp.allclose(out, ref, atol=1e-5, rtol=1e-5)

    # 2) Non-trivial B to exercise the real compute path.
    B_rand = jax.random.normal(kb, (rank, feature_out), jnp.float32)
    out2 = jax.block_until_ready(lora_forward(x, A, B_rand, alpha))
    ref2 = alpha * (x @ A @ B_rand)
    assert jnp.allclose(out2, ref2, atol=1e-4, rtol=1e-4)

    # 3) Ragged batch + non-128-multiple feature_out: exercises the masked partial
    #    tail block (no jnp.pad of x), fout padding, and the 2-D (row, col) grid.
    M3, fin3, fout3, r3 = 100, 256, 384, 4
    bound3 = 1.0 / math.sqrt(r3)
    x3 = jax.random.normal(kx3, (M3, fin3), jnp.float32)
    A3 = jax.random.uniform(ka3, (fin3, r3), jnp.float32,
                            minval=-bound3, maxval=bound3)
    B3 = jax.random.normal(kb3, (r3, fout3), jnp.float32) * 0.05
    out3 = jax.block_until_ready(lora_forward(x3, A3, B3, 0.5))
    ref3 = 0.5 * jnp.dot(jnp.dot(x3, A3, precision="highest"), B3,
                         precision="highest")
    assert out3.shape == (M3, fout3)
    assert jnp.allclose(out3, ref3, atol=2e-3, rtol=2e-3)

    # 4) Optional bf16 compute path (halved HBM bytes); loose tolerance by design.
    out4 = jax.block_until_ready(
        lora_forward(x3, A3, B3, 0.5, compute_dtype=jnp.bfloat16))
    assert out4.dtype == jnp.bfloat16
    assert jnp.allclose(out4.astype(jnp.float32), ref3, atol=0.1, rtol=0.1)

    print("KERNEL_OK")
</pallas_src>

<mosaic_0001>
module attributes {stable_mosaic.version = 11 : i64} {
  func.func @_lora_kernel(%arg0: i32, %arg1: i32, %arg2: memref<1xf32, #tpu.memory_space<smem>>, %arg3: memref<8x32xf32, #tpu.memory_space<vmem>>, %arg4: memref<32x8xf32, #tpu.memory_space<vmem>>, %arg5: memref<8x128xf32, #tpu.memory_space<vmem>>, %arg6: memref<8x128xf32, #tpu.memory_space<vmem>>) attributes {dimension_semantics = [#tpu.dimension_semantics<parallel>, #tpu.dimension_semantics<parallel>], iteration_bounds = array<i64: 1, 1>, scalar_prefetch = 0 : i64, scratch_operands = 0 : i64, tpu.core_type = #tpu.core_type<tc>, window_params = [{transform_indices = @transform_0, window_bounds = array<i64: 1>}, {transform_indices = @transform_1, window_bounds = array<i64: 8, 32>}, {pipeline_mode = #tpu.pipeline_mode<synchronous>, transform_indices = @transform_2, window_bounds = array<i64: 32, 8>}, {transform_indices = @transform_3, window_bounds = array<i64: 8, 128>}, {transform_indices = @transform_4, window_bounds = array<i64: 8, 128>}]} {
    %c0 = arith.constant 0 : index
    %c0_0 = arith.constant 0 : index
    %0 = vector.load %arg3[%c0, %c0_0] : memref<8x32xf32, #tpu.memory_space<vmem>>, vector<8x32xf32>
    %c0_1 = arith.constant 0 : index
    %c0_2 = arith.constant 0 : index
    %1 = vector.load %arg4[%c0_1, %c0_2] : memref<32x8xf32, #tpu.memory_space<vmem>>, vector<32x8xf32>
    %cst = arith.constant dense<0.000000e+00> : vector<8x8xf32>
    %2 = tpu.matmul %0, %1, %cst {dimension_numbers = #tpu.dot_dimension_numbers<[1], [0], [0], [1], [0, 0, 1, 1], [], []>} : vector<8x32xf32>, vector<32x8xf32>, vector<8x8xf32> -> vector<8x8xf32>
    %c0_3 = arith.constant 0 : index
    %3 = memref.load %arg2[%c0_3] : memref<1xf32, #tpu.memory_space<smem>>
    %4 = vector.broadcast %3 : f32 to vector<8x8xf32>
    %5 = arith.mulf %4, %2 : vector<8x8xf32>
    %c0_4 = arith.constant 0 : index
    %c0_5 = arith.constant 0 : index
    %6 = vector.load %arg5[%c0_4, %c0_5] : memref<8x128xf32, #tpu.memory_space<vmem>>, vector<8x128xf32>
    %cst_6 = arith.constant dense<0.000000e+00> : vector<8x128xf32>
    %7 = tpu.matmul %5, %6, %cst_6 {dimension_numbers = #tpu.dot_dimension_numbers<[1], [0], [0], [1], [0, 0, 1, 1], [], []>} : vector<8x8xf32>, vector<8x128xf32>, vector<8x128xf32> -> vector<8x128xf32>
    %c0_7 = arith.constant 0 : index
    %c0_8 = arith.constant 0 : index
    %8 = vector.load %arg6[%c0_7, %c0_8] : memref<8x128xf32, #tpu.memory_space<vmem>>, vector<8x128xf32>
    tpu.vector_store %arg6[%c0_7, %c0_8], %7 {strides = array<i32>} : memref<8x128xf32, #tpu.memory_space<vmem>>, vector<8x128xf32>,
    return
  }
  func.func @transform_0(%arg0: i32, %arg1: i32) -> i32 {
    %c0_i32 = arith.constant 0 : i32
    %c0_i32_0 = arith.constant 0 : i32
    return %c0_i32 : i32
  }
  func.func @transform_1(%arg0: i32, %arg1: i32) -> (i32, i32) {
    %c0_i32 = arith.constant 0 : i32
    %c0_i32_0 = arith.constant 0 : i32
    return %arg0, %c0_i32 : i32, i32
  }
  func.func @transform_2(%arg0: i32, %arg1: i32) -> (i32, i32) {
    %c0_i32 = arith.constant 0 : i32
    %c0_i32_0 = arith.constant 0 : i32
    %c0_i32_1 = arith.constant 0 : i32
    return %c0_i32, %c0_i32_0 : i32, i32
  }
  func.func @transform_3(%arg0: i32, %arg1: i32) -> (i32, i32) {
    %c0_i32 = arith.constant 0 : i32
    %c0_i32_0 = arith.constant 0 : i32
    return %c0_i32, %arg1 : i32, i32
  }
  func.func @transform_4(%arg0: i32, %arg1: i32) -> (i32, i32) {
    %c0_i32 = arith.constant 0 : i32
    return %arg0, %arg1 : i32, i32
  }
}

</mosaic_0001>

<bundles_post_ra>
// kernel: tpu_custom_call.1
= control target key start
LH: loop header
LB: loop body
LE: loop exit
PB: predicated region body
PF: predicated region fallthrough
CT: control target
= control target key end

     0   :  { %v241_v1 = vmov 0.0   ;;  %vm242_vm0 = vmmov 0   ;;  %s293_s0 = inlined_call_operand.<no memory space> [shape: f32[1], index: 0, kind: input, shape index: {}]   ;;  %s294_s1 = inlined_call_operand.vmem [shape: f32[8,32], index: 1, kind: input, shape index: {}]   ;;  %s295_s2 = inlined_call_operand.vmem [shape: f32[32,8], index: 2, kind: input, shape index: {}]   ;;  %s296_s3 = inlined_call_operand.vmem [shape: f32[8,128], index: 3, kind: input, shape index: {}]   ;;  %s297_s4 = inlined_call_operand.hbm [shape: f32[8,128], index: 4, kind: output, shape index: {}]  }
   0x1   :  { %v23_v0 = vld [vmem:[%s295_s2 + $0x18] sm:$0xff]  ;;  %200 = vmatprep.subr.mxu0 %v241_v1  ;;  %v22_v2 = vld [vmem:[%s295_s2 + $0x10] sm:$0xff]  ;;  %208 = vmatprep.mubr.msk.f32.mxu0 %vm242_vm0, %v241_v1 }
   0x2   :  { %10 = vsyncpa [#allocation4], 0  ;;  %201 = vmatpush3.msra.mxu0 %v23_v0  ;;  %211 = vmatprep.subr.mxu1 %v241_v1  ;;  %v21_v3 = vld [vmem:[%s295_s2 + $0x8] sm:$0xff]  ;;  %v20_v4 = vld [vmem:[%s295_s2] sm:$0xff]  ;;  %vm24_vm1 = vcmask 261120   ;;  %v99_v7 = vstv %s293_s0  ;;  %vm102_vm2 = vcmask 64512  }
   0x3   :  { %202 = vmatprep.subr.mxu0 %v241_v1  ;;  %213 = vmatprep.mubr.msk.f32.mxu1 %vm242_vm0, %v241_v1  ;;  %v19_v5 = vld [vmem:[%s294_s1] sm:$0xff]  ;;  %s243_s2 = smov [#allocation3]  }
   0x4   :  { %203 = vmatpush3.msra.mxu0 %v22_v2  ;;  %v101_v6 = vld [vmem:[%s296_s3] sm:$0xff]  ;;  %s183_s1 = sshll.u32 %s243_s2, 4  ;;  %s184_s1 = int_to_ptr.vmem [resolvable:$true] %s183_s1 }
   0x5   :  { %204 = vmatprep.subr.mxu0 %v241_v1  ;;  %212 = vmatpush3.msra.mxu1 %v101_v6  ;;  %s219_s29 = scalar_lea.vmem %s184_s1, 128  ;;  %p224_p1 = scmp.lt.s32.totalorder %s184_s1, %s184_s1 }
   0x6   :  { %205 = vmatpush3.msra.mxu0 %v21_v3  ;;  %p220_p0 = scmp.ne.s32.totalorder %s184_s1, %s219_s29  ;;  %p225_p2 = scmp.lt.s32.totalorder %s219_s29, %s219_s29 }
   0x7   :  { %206 = vmatprep.subr.mxu0 %v241_v1 }
   0x8   :  { %207 = vmatpush3.msra.mxu0 %v20_v4  ;;  %p226_p3 = por %p225_p2, %p224_p1 }
   0x9   :  { %209 = vmatmul.mubr.msk.f32.vlgmr.msra.gmra.mxu0 %vm24_vm1, %v19_v5 }
   0xa   :  { %p227_p4 = pnand %p226_p3, %p220_p0 }
  0xc9   :  { %v94_v8 = vpop.f32.mrf.mxu0 }
  0xca   :  { %v100_v9 = vmul.f32 %v99_v7, %v94_v8 }
  0xcb   :  { %v210_v10 = vpop.f32.mrf.mxu0 }
  0xcc   :  { %214 = vmatmul.mubr.msk.f32.vlgmr.msra.gmra.mxu1 %vm102_vm2, %v100_v9 }
 0x18c   :  { %v172_v11 = vpop.f32.mrf.mxu1 }
 0x18d   :  { %176 = vst [vmem:[#allocation3] sm:$0xff] %v172_v11 }
 0x18e   :  { %v215_v12 = vpop.f32.mrf.mxu1 }
 0x18f   :  { %230 = shalt.err (!%p227_p4)
}
 0x190   :  { %186 = dma.vmem_to_hbm [thread:$0]  %s184_s1, 128, %s297_s4, [#allocation4]  }
 0x191   :  { %239 = dma.done.wait [#allocation4], 128  }
 0x192   :  { %240 = vsyncadd [#allocation4], 4294967168 }
 0x193   :  { %190 = vsyncpa [#allocation4], 1 }

</bundles_post_ra>
